<compile_context>
chip_gen: v7x
topology: tpu7x:2x2x1
jax: 0.10.0
libtpu: 0.0.40
codegen_flags: <defaults>
</compile_context>

<pallas_src>
import math
import functools

import jax
import jax.numpy as jnp
from jax.experimental import pallas as pl
from jax.experimental.pallas import tpu as pltpu


def _gelu(x):
    # tanh-approximate GELU (transformers "gelu_new").
    # NOTE: a base model using exact-erf GELU differs slightly; match if needed.
    c = math.sqrt(2.0 / math.pi)
    return 0.5 * x * (1.0 + jnp.tanh(c * (x + 0.044715 * x * x * x)))


def _pick_tile(dim, cap):
    """Largest tile <= cap that divides dim."""
    t = min(dim, cap)
    while dim % t:
        t -= 1
    return t


def pellm_fused_kernel(x_ref, w_ref, b_ref, wc_ref, bc_ref, out_ref,
                       acc_ref, pool_ref, *, inv_seq_len):
    # x_ref  : (tb, ts, tk)  bf16  embedded-token tile
    # w_ref  : (tk, H)       bf16  LoRA-merged weight tile (K-slice, full N)
    # b_ref  : (1, H)        f32   base-linear bias
    # wc_ref : (H, C)        bf16  classifier weight
    # bc_ref : (1, C)        f32   classifier bias
    # out_ref: (tb, C)       f32   logits (resident across seq / K axes)
    # acc_ref: (tb*ts, H)    f32   K-reduction accumulator
    # pool_ref:(tb, H)       f32   sequence-sum accumulator
    si = pl.program_id(1)
    ki = pl.program_id(2)
    ns = pl.num_programs(1)
    nk = pl.num_programs(2)

    tb, ts, tk = x_ref.shape
    h_out = w_ref.shape[1]

    @pl.when(jnp.logical_and(si == 0, ki == 0))
    def _():
        pool_ref[...] = jnp.zeros_like(pool_ref)

    @pl.when(ki == 0)
    def _():
        acc_ref[...] = jnp.zeros_like(acc_ref)

    # MXU: bf16 operands, f32 accumulation.  Flatten (tb, ts) -> M rows so the
    # matmul runs as one 2-D tile instead of tb small batched matmuls.
    x2d = x_ref[...].reshape(tb * ts, tk)
    acc_ref[...] += jnp.dot(x2d, w_ref[...],
                            preferred_element_type=jnp.float32)

    @pl.when(ki == nk - 1)
    def _():
        # Epilogue of the K reduction: bias + GELU in f32, then partial
        # sequence sum into the pooling accumulator.
        h = _gelu(acc_ref[...] + b_ref[...])                  # (tb*ts, H)
        pool_ref[...] += h.reshape(tb, ts, h_out).sum(axis=1)  # (tb, H)

    @pl.when(jnp.logical_and(si == ns - 1, ki == nk - 1))
    def _():
        # Final epilogue: mean-pool scale, classifier matmul, classifier bias.
        pooled = pool_ref[...] * inv_seq_len                   # (tb, H) f32
        logits = jnp.dot(pooled.astype(wc_ref.dtype), wc_ref[...],
                         preferred_element_type=jnp.float32) + bc_ref[...]
        out_ref[...] = logits.astype(out_ref.dtype)


def pellm_forward(x_emb, params, *, lora_alpha, lora_r):
    B, S, H = x_emb.shape
    C = params['wc'].shape[1]
    scale = float(lora_alpha) / float(lora_r)

    # --- one-time parameter prep (inference-style LoRA merge) -------------
    # W' = W + (alpha/r) * A @ B  in f32, then cast MXU operands to bf16.
    w_merged = (params['w'] +
                scale * jnp.dot(params['a'], params['bb'])).astype(jnp.bfloat16)
    wc = params['wc'].astype(jnp.bfloat16)
    x = x_emb.astype(jnp.bfloat16)
    b = params['b'].astype(jnp.float32)
    bc = params['bc'].astype(jnp.float32)

    # Tile selection.  Caps are modest so the VMEM footprint
    # (~2*(tb*ts*tk + tk*H) bf16 + (tb*ts + tb)*H f32) stays well inside the
    # 64 MiB v7x budget; re-derive for very large hidden sizes.
    tb = _pick_tile(B, 8)
    ts = _pick_tile(S, 64)
    tk = _pick_tile(H, 512)
    grid = (B // tb, S // ts, H // tk)

    kernel = functools.partial(pellm_fused_kernel, inv_seq_len=1.0 / S)

    return pl.pallas_call(
        kernel,
        out_shape=jax.ShapeDtypeStruct((B, C), jnp.float32),
        grid_spec=pltpu.PrefetchScalarGridSpec(
            num_scalar_prefetch=0,
            grid=grid,
            in_specs=[
                pl.BlockSpec((tb, ts, tk), lambda bi, si, ki: (bi, si, ki)),
                pl.BlockSpec((tk, H),      lambda bi, si, ki: (ki, 0)),
                pl.BlockSpec((1, H),       lambda bi, si, ki: (0, 0)),
                pl.BlockSpec((H, C),       lambda bi, si, ki: (0, 0)),
                pl.BlockSpec((1, C),       lambda bi, si, ki: (0, 0)),
            ],
            out_specs=pl.BlockSpec((tb, C), lambda bi, si, ki: (bi, 0)),
            scratch_shapes=[
                pltpu.VMEM((tb * ts, H), jnp.float32),   # K accumulator
                pltpu.VMEM((tb, H), jnp.float32),        # sequence-sum pool
            ],
        ),
        compiler_params=pltpu.CompilerParams(
            dimension_semantics=("parallel", "arbitrary", "arbitrary"),
            vmem_limit_bytes=48 * 1024 * 1024,
        ),
    )(x, w_merged, b, wc, bc)


def pellm_forward_ref(x_emb, params, *, lora_alpha, lora_r):
    # Pure-JAX f32 reference with the *unmerged* LoRA path (original module
    # semantics) for the correctness check.
    scale = float(lora_alpha) / float(lora_r)
    x = x_emb.astype(jnp.float32)
    base = jnp.einsum('bsh,hd->bsd', x, params['w'])
    lora = jnp.einsum('bsr,rd->bsd',
                      jnp.einsum('bsh,hr->bsr', x, params['a']),
                      params['bb'])
    h = _gelu(base + scale * lora + params['b'][None, :, :])
    pooled = jnp.mean(h, axis=1)
    return jnp.dot(pooled, params['wc']) + params['bc']


if __name__ == "__main__":
    # Small synthetic shapes consistent with an LM + SEQ_CLS head.
    VOCAB, B, S, H, R, C = 100, 2, 8, 32, 8, 2
    LORA_ALPHA = 16

    key = jax.random.PRNGKey(0)
    k_emb, k_w, k_b, k_a, k_bb, k_wc, k_bc, k_ids = jax.random.split(key, 8)

    # Deterministic "pretrained" parameters (synthetic — no checkpoint load).
    emb_table = jax.random.normal(k_emb, (VOCAB, H), jnp.float32) * 0.5
    params = {
        'w':  jax.random.normal(k_w,  (H, H), jnp.float32) * 0.2,
        'b':  jax.random.normal(k_b,  (1, H), jnp.float32) * 0.1,
        'a':  jax.random.normal(k_a,  (H, R), jnp.float32) * 0.2,
        'bb': jax.random.normal(k_bb, (R, H), jnp.float32) * 0.2,
        'wc': jax.random.normal(k_wc, (H, C), jnp.float32) * 0.2,
        'bc': jax.random.normal(k_bc, (1, C), jnp.float32) * 0.1,
    }

    token_ids = jax.random.randint(k_ids, (B, S), 0, VOCAB)
    # Embedding lookup is glue (plain JAX gather).
    x_emb = jnp.take(emb_table, token_ids, axis=0)   # (B, S, H)

    logits = pellm_forward(x_emb, params, lora_alpha=LORA_ALPHA, lora_r=R)
    logits = jax.block_until_ready(logits)

    ref = pellm_forward_ref(x_emb, params, lora_alpha=LORA_ALPHA, lora_r=R)
    assert logits.shape == (B, C)
    # Tolerance accounts for bf16 MXU operands vs the f32 reference.
    assert jnp.allclose(logits, ref, rtol=2e-2, atol=2e-2), (
        f"max abs diff {jnp.max(jnp.abs(logits - ref))}")

    # TODO(synk): full pretrained-LM stack (multi-layer attention, tokenizer,
    # HF/PEFT checkpoint loading, pad-aware SEQ_CLS pooling) is outside the
    # scope of a self-contained synthetic kernel.
    print("KERNEL_OK")
</pallas_src>

<mosaic_0001>
module attributes {stable_mosaic.version = 11 : i64} {
  func.func @pellm_fused_kernel(%arg0: i32, %arg1: i32, %arg2: i32, %arg3: memref<2x8x32xbf16, #tpu.memory_space<vmem>>, %arg4: memref<32x32xbf16, #tpu.memory_space<vmem>>, %arg5: memref<1x32xf32, #tpu.memory_space<vmem>>, %arg6: memref<32x2xbf16, #tpu.memory_space<vmem>>, %arg7: memref<1x2xf32, #tpu.memory_space<vmem>>, %arg8: memref<2x2xf32, #tpu.memory_space<vmem>>, %arg9: memref<16x32xf32, #tpu.memory_space<vmem>>, %arg10: memref<2x32xf32, #tpu.memory_space<vmem>>) attributes {dimension_semantics = [#tpu.dimension_semantics<parallel>, #tpu.dimension_semantics<arbitrary>, #tpu.dimension_semantics<arbitrary>], iteration_bounds = array<i64: 1, 1, 1>, scalar_prefetch = 0 : i64, scratch_operands = 2 : i64, tpu.core_type = #tpu.core_type<tc>, window_params = [{transform_indices = @transform_0, window_bounds = array<i64: 2, 8, 32>}, {transform_indices = @transform_1, window_bounds = array<i64: 32, 32>}, {pipeline_mode = #tpu.pipeline_mode<synchronous>, transform_indices = @transform_2, window_bounds = array<i64: 1, 32>}, {pipeline_mode = #tpu.pipeline_mode<synchronous>, transform_indices = @transform_3, window_bounds = array<i64: 32, 2>}, {pipeline_mode = #tpu.pipeline_mode<synchronous>, transform_indices = @transform_4, window_bounds = array<i64: 1, 2>}, {transform_indices = @transform_5, window_bounds = array<i64: 2, 2>}]} {
    %c0_i32 = arith.constant 0 : i32
    %0 = arith.cmpi eq, %arg1, %c0_i32 : i32
    %c0_i32_0 = arith.constant 0 : i32
    %1 = arith.cmpi eq, %arg2, %c0_i32_0 : i32
    %2 = arith.andi %0, %1 : i1
    %3 = arith.extui %2 : i1 to i32
    %c0_i32_1 = arith.constant 0 : i32
    %4 = arith.cmpi ne, %3, %c0_i32_1 : i32
    scf.if %4 {
      %cst_17 = arith.constant 0.000000e+00 : f32
      %23 = vector.broadcast %cst_17 : f32 to vector<2x32xf32>
      %c0_18 = arith.constant 0 : index
      %c0_19 = arith.constant 0 : index
      %24 = vector.load %arg10[%c0_18, %c0_19] : memref<2x32xf32, #tpu.memory_space<vmem>>, vector<2x32xf32>
      tpu.vector_store %arg10[%c0_18, %c0_19], %23 {strides = array<i32>} : memref<2x32xf32, #tpu.memory_space<vmem>>, vector<2x32xf32>,
    } else {
    }
    %c0_i32_2 = arith.constant 0 : i32
    %5 = arith.cmpi eq, %arg2, %c0_i32_2 : i32
    %6 = arith.extui %5 : i1 to i32
    %c0_i32_3 = arith.constant 0 : i32
    %7 = arith.cmpi ne, %6, %c0_i32_3 : i32
    scf.if %7 {
      %cst_17 = arith.constant 0.000000e+00 : f32
      %23 = vector.broadcast %cst_17 : f32 to vector<16x32xf32>
      %c0_18 = arith.constant 0 : index
      %c0_19 = arith.constant 0 : index
      %24 = vector.load %arg9[%c0_18, %c0_19] : memref<16x32xf32, #tpu.memory_space<vmem>>, vector<16x32xf32>
      tpu.vector_store %arg9[%c0_18, %c0_19], %23 {strides = array<i32>} : memref<16x32xf32, #tpu.memory_space<vmem>>, vector<16x32xf32>,
    } else {
    }
    %c0 = arith.constant 0 : index
    %c0_4 = arith.constant 0 : index
    %c0_5 = arith.constant 0 : index
    %8 = vector.load %arg3[%c0, %c0_4, %c0_5] : memref<2x8x32xbf16, #tpu.memory_space<vmem>>, vector<2x8x32xbf16>
    %9 = vector.shape_cast %8 : vector<2x8x32xbf16> to vector<16x32xbf16>
    %c0_6 = arith.constant 0 : index
    %c0_7 = arith.constant 0 : index
    %10 = vector.load %arg9[%c0_6, %c0_7] : memref<16x32xf32, #tpu.memory_space<vmem>>, vector<16x32xf32>
    %c0_8 = arith.constant 0 : index
    %c0_9 = arith.constant 0 : index
    %11 = vector.load %arg4[%c0_8, %c0_9] : memref<32x32xbf16, #tpu.memory_space<vmem>>, vector<32x32xbf16>
    %cst = arith.constant dense<0.000000e+00> : vector<16x32xf32>
    %12 = tpu.matmul %9, %11, %cst {dimension_numbers = #tpu.dot_dimension_numbers<[1], [0], [0], [1], [0, 0, 1, 1], [], []>} : vector<16x32xbf16>, vector<32x32xbf16>, vector<16x32xf32> -> vector<16x32xf32>
    %13 = arith.addf %10, %12 : vector<16x32xf32>
    %c0_10 = arith.constant 0 : index
    %c0_11 = arith.constant 0 : index
    %14 = vector.load %arg9[%c0_10, %c0_11] : memref<16x32xf32, #tpu.memory_space<vmem>>, vector<16x32xf32>
    tpu.vector_store %arg9[%c0_10, %c0_11], %13 {strides = array<i32>} : memref<16x32xf32, #tpu.memory_space<vmem>>, vector<16x32xf32>,
    %c0_i32_12 = arith.constant 0 : i32
    %15 = arith.cmpi eq, %arg2, %c0_i32_12 : i32
    %16 = arith.extui %15 : i1 to i32
    %c0_i32_13 = arith.constant 0 : i32
    %17 = arith.cmpi ne, %16, %c0_i32_13 : i32
    scf.if %17 {
      %c0_17 = arith.constant 0 : index
      %c0_18 = arith.constant 0 : index
      %23 = vector.load %arg9[%c0_17, %c0_18] : memref<16x32xf32, #tpu.memory_space<vmem>>, vector<16x32xf32>
      %c0_19 = arith.constant 0 : index
      %c0_20 = arith.constant 0 : index
      %24 = vector.load %arg5[%c0_19, %c0_20] : memref<1x32xf32, #tpu.memory_space<vmem>>, vector<1x32xf32>
      %25 = vector.broadcast %24 : vector<1x32xf32> to vector<16x32xf32>
      %26 = arith.addf %23, %25 : vector<16x32xf32>
      %cst_21 = arith.constant 5.000000e-01 : f32
      %27 = vector.broadcast %cst_21 : f32 to vector<16x32xf32>
      %28 = arith.mulf %27, %26 : vector<16x32xf32>
      %cst_22 = arith.constant 4.471500e-02 : f32
      %29 = vector.broadcast %cst_22 : f32 to vector<16x32xf32>
      %30 = arith.mulf %29, %26 : vector<16x32xf32>
      %31 = arith.mulf %30, %26 : vector<16x32xf32>
      %32 = arith.mulf %31, %26 : vector<16x32xf32>
      %33 = arith.addf %26, %32 : vector<16x32xf32>
      %cst_23 = arith.constant 0.797884583 : f32
      %34 = vector.broadcast %cst_23 : f32 to vector<16x32xf32>
      %35 = arith.mulf %34, %33 : vector<16x32xf32>
      %36 = math.tanh %35 : vector<16x32xf32>
      %cst_24 = arith.constant 1.000000e+00 : f32
      %37 = vector.broadcast %cst_24 : f32 to vector<16x32xf32>
      %38 = arith.addf %37, %36 : vector<16x32xf32>
      %39 = arith.mulf %28, %38 : vector<16x32xf32>
      %c0_25 = arith.constant 0 : index
      %c0_26 = arith.constant 0 : index
      %40 = vector.load %arg10[%c0_25, %c0_26] : memref<2x32xf32, #tpu.memory_space<vmem>>, vector<2x32xf32>
      %41 = vector.shape_cast %39 : vector<16x32xf32> to vector<2x8x32xf32>
      %cst_27 = arith.constant dense<0.000000e+00> : vector<2x32xf32>
      %42 = vector.multi_reduction <add>, %41, %cst_27 [1] : vector<2x8x32xf32> to vector<2x32xf32>
      %43 = arith.addf %40, %42 : vector<2x32xf32>
      %c0_28 = arith.constant 0 : index
      %c0_29 = arith.constant 0 : index
      %44 = vector.load %arg10[%c0_28, %c0_29] : memref<2x32xf32, #tpu.memory_space<vmem>>, vector<2x32xf32>
      tpu.vector_store %arg10[%c0_28, %c0_29], %43 {strides = array<i32>} : memref<2x32xf32, #tpu.memory_space<vmem>>, vector<2x32xf32>,
    } else {
    }
    %c0_i32_14 = arith.constant 0 : i32
    %18 = arith.cmpi eq, %arg1, %c0_i32_14 : i32
    %c0_i32_15 = arith.constant 0 : i32
    %19 = arith.cmpi eq, %arg2, %c0_i32_15 : i32
    %20 = arith.andi %18, %19 : i1
    %21 = arith.extui %20 : i1 to i32
    %c0_i32_16 = arith.constant 0 : i32
    %22 = arith.cmpi ne, %21, %c0_i32_16 : i32
    scf.if %22 {
      %c0_17 = arith.constant 0 : index
      %c0_18 = arith.constant 0 : index
      %23 = vector.load %arg10[%c0_17, %c0_18] : memref<2x32xf32, #tpu.memory_space<vmem>>, vector<2x32xf32>
      %cst_19 = arith.constant 1.250000e-01 : f32
      %24 = vector.broadcast %cst_19 : f32 to vector<2x32xf32>
      %25 = arith.mulf %23, %24 : vector<2x32xf32>
      %26 = arith.truncf %25 : vector<2x32xf32> to vector<2x32xbf16>
      %c0_20 = arith.constant 0 : index
      %c0_21 = arith.constant 0 : index
      %27 = vector.load %arg6[%c0_20, %c0_21] : memref<32x2xbf16, #tpu.memory_space<vmem>>, vector<32x2xbf16>
      %cst_22 = arith.constant dense<0.000000e+00> : vector<2x2xf32>
      %28 = tpu.matmul %26, %27, %cst_22 {dimension_numbers = #tpu.dot_dimension_numbers<[1], [0], [0], [1], [0, 0, 1, 1], [], []>} : vector<2x32xbf16>, vector<32x2xbf16>, vector<2x2xf32> -> vector<2x2xf32>
      %c0_23 = arith.constant 0 : index
      %c0_24 = arith.constant 0 : index
      %29 = vector.load %arg7[%c0_23, %c0_24] : memref<1x2xf32, #tpu.memory_space<vmem>>, vector<1x2xf32>
      %30 = vector.broadcast %29 : vector<1x2xf32> to vector<2x2xf32>
      %31 = arith.addf %28, %30 : vector<2x2xf32>
      %c0_25 = arith.constant 0 : index
      %c0_26 = arith.constant 0 : index
      %32 = vector.load %arg8[%c0_25, %c0_26] : memref<2x2xf32, #tpu.memory_space<vmem>>, vector<2x2xf32>
      tpu.vector_store %arg8[%c0_25, %c0_26], %31 {strides = array<i32>} : memref<2x2xf32, #tpu.memory_space<vmem>>, vector<2x2xf32>,
    } else {
    }
    return
  }
  func.func @transform_0(%arg0: i32, %arg1: i32, %arg2: i32) -> (i32, i32, i32) {
    %c0_i32 = arith.constant 0 : i32
    return %arg0, %arg1, %arg2 : i32, i32, i32
  }
  func.func @transform_1(%arg0: i32, %arg1: i32, %arg2: i32) -> (i32, i32) {
    %c0_i32 = arith.constant 0 : i32
    %c0_i32_0 = arith.constant 0 : i32
    return %arg2, %c0_i32 : i32, i32
  }
  func.func @transform_2(%arg0: i32, %arg1: i32, %arg2: i32) -> (i32, i32) {
    %c0_i32 = arith.constant 0 : i32
    %c0_i32_0 = arith.constant 0 : i32
    %c0_i32_1 = arith.constant 0 : i32
    return %c0_i32, %c0_i32_0 : i32, i32
  }
  func.func @transform_3(%arg0: i32, %arg1: i32, %arg2: i32) -> (i32, i32) {
    %c0_i32 = arith.constant 0 : i32
    %c0_i32_0 = arith.constant 0 : i32
    %c0_i32_1 = arith.constant 0 : i32
    return %c0_i32, %c0_i32_0 : i32, i32
  }
  func.func @transform_4(%arg0: i32, %arg1: i32, %arg2: i32) -> (i32, i32) {
    %c0_i32 = arith.constant 0 : i32
    %c0_i32_0 = arith.constant 0 : i32
    %c0_i32_1 = arith.constant 0 : i32
    return %c0_i32, %c0_i32_0 : i32, i32
  }
  func.func @transform_5(%arg0: i32, %arg1: i32, %arg2: i32) -> (i32, i32) {
    %c0_i32 = arith.constant 0 : i32
    %c0_i32_0 = arith.constant 0 : i32
    return %arg0, %c0_i32 : i32, i32
  }
}

</mosaic_0001>

<bundles_post_ra>
// kernel: tpu_custom_call.1
= control target key start
LH: loop header
LB: loop body
LE: loop exit
PB: predicated region body
PF: predicated region fallthrough
CT: control target
= control target key end

     0   :  { %10 = vsyncpa [#allocation5], 0  ;;  %s449_s0 = inlined_call_operand.hbm [shape: bf16[2,8,32], index: 0, kind: input, shape index: {}]   ;;  %s450_s1 = inlined_call_operand.vmem [shape: bf16[32,32], index: 1, kind: input, shape index: {}]   ;;  %s451_s2 = inlined_call_operand.vmem [shape: f32[1,32], index: 2, kind: input, shape index: {}]   ;;  %s452_s3 = inlined_call_operand.vmem [shape: bf16[32,2], index: 3, kind: input, shape index: {}]   ;;  %s453_s4 = inlined_call_operand.vmem [shape: f32[1,2], index: 4, kind: input, shape index: {}]   ;;  %s454_s5 = inlined_call_operand.hbm [shape: f32[2,2], index: 5, kind: output, shape index: {}]  }
   0x1   :  { %11 = vsyncpa [#allocation6], 0  ;;  %s361_s18 = smov [#allocation4]   ;;  %s313_s22 = scalar_lea.hbm %s449_s0, 128 }
   0x2   :  { %s17_s19 = sshll.u32 %s361_s18, 4  ;;  %p314_p0 = scmp.ne.s32.totalorder %s449_s0, %s313_s22  ;;  %s18_s19 = int_to_ptr.vmem [resolvable:$true] %s17_s19 }
   0x3   :  { %p317_p1 = scmp.lt.u32.totalorder %s313_s22, %s449_s0 }
   0x5   :  { %p319_p2 = pnand %p317_p1, %p314_p0 }
   0x7   :  { %322 = shalt.err (!%p319_p2)
}
   0x8   :  { %s323_s27 = scalar_lea.vmem %s18_s19, 128  ;;  %p328_p4 = scmp.lt.s32.totalorder %s18_s19, %s18_s19 }
   0x9   :  { %p324_p3 = scmp.ne.s32.totalorder %s18_s19, %s323_s27  ;;  %p329_p5 = scmp.lt.s32.totalorder %s323_s27, %s323_s27 }
   0xb   :  { %p330_p6 = por %p329_p5, %p328_p4 }
   0xd   :  { %p331_p7 = pnand %p330_p6, %p324_p3 }
   0xf   :  { %334 = shalt.err (!%p331_p7)
}
  0x10   :  { %s362_s28 = smov 64   ;;  %s363_s29 = smov 4  }
  0x11   :  { %23 = dma.hbm_to_vmem [thread:$0]  %s449_s0, 128, %s18_s19, [#allocation5], %s362_s28, %s362_s28, %s363_s29  }
  0x12   :  { %357 = dma.done.wait [#allocation5], 128  }
  0x13   :  { %358 = vsyncadd [#allocation5], 4294967168  ;;  %vm42_vm0 = vcmask 254976   ;;  %vm47_vm1 = vcmask 261120   ;;  %v364_v0 = vmov 0.0   ;;  %vm365_vm2 = vmmov 0  }
  0x14   :  { %43 = vst.msk [vmem:[#allocation3] sm:$0x3] %vm42_vm0, %v364_v0  ;;  %282 = vmatprep.subr.bf16.mxu0 %v364_v0  ;;  %286 = vmatprep.mubr.msk.bf16.mxu0 %vm365_vm2, %v364_v0  ;;  %v304_v1 = vld [vmem:[%s450_s1] sm:$0xff]   ;;  %v305_v2 = vld [vmem:[%s450_s1 + $0x8] sm:$0xff]   ;;  %v306_v3 = vld [vmem:[#allocation4] sm:$0xff]   ;;  %vm173_vm3 = vcmask 1041409  }
  0x15   :  { %48 = vst.msk [vmem:[#allocation2] sm:$0xff] %vm47_vm1, %v364_v0  ;;  %49 = vst.msk [vmem:[#allocation2 + $0x8] sm:$0xff] %vm47_vm1, %v364_v0  ;;  %290 = vmatprep.subr.bf16.mxu1 %v364_v0  ;;  %294 = vmatprep.mubr.msk.bf16.mxu1 %vm365_vm2, %v364_v0  ;;  %v307_v4 = vld [vmem:[%s452_s3] sm:$0xff]   ;;  %v308_v5 = vld [vmem:[%s452_s3 + $0x8] sm:$0xff]   ;;  %s366_s15 = smov [#allocation7]   ;;  %vm250_vm4 = vcmask 9216  }
  0x16   :  { %283 = vmatpush3.bf16.msra.mxu0 %v304_v1  ;;  %291 = vmatpush3.bf16.msra.mxu1 %v307_v4  ;;  %v271_v14 = vld [vmem:[%s451_s2] ss:$0 sm:$0xff]  ;;  %s258_s16 = sshll.u32 %s366_s15, 4  ;;  %s259_s16 = int_to_ptr.vmem [resolvable:$true] %s258_s16 }
  0x17   :  { %284 = vmatprep.subr.bf16.mxu0 %v364_v0  ;;  %292 = vmatprep.subr.bf16.mxu1 %v364_v0  ;;  %v272_v57 = vld [vmem:[%s453_s4] ss:$0 sm:$0xff]  ;;  %s335_s17 = scalar_lea.vmem %s259_s16, 32  ;;  %p340_p9 = scmp.lt.s32.totalorder %s259_s16, %s259_s16 }
  0x18   :  { %p336_p8 = scmp.ne.s32.totalorder %s259_s16, %s335_s17  ;;  %p341_p10 = scmp.lt.s32.totalorder %s335_s17, %s335_s17 }
  0x1a   :  { %285 = vmatpush3.bf16.msra.mxu0 %v305_v2  ;;  %293 = vmatpush3.bf16.msra.mxu1 %v308_v5  ;;  %p342_p11 = por %p341_p10, %p340_p9 }
  0x1b   :  { %v156_v49 = vld [vmem:[#allocation3] sm:$0x3] }
  0x1c   :  { %v52_v6 = vld [vmem:[#allocation2] sm:$0xff]  ;;  %v53_v8 = vld [vmem:[#allocation2 + $0x8] sm:$0xff]  ;;  %p343_p12 = pnand %p342_p11, %p336_p8 }
  0x1d   :  { %287 = vmatmul.mubr.msk.bf16.vlgmr.msra.gmra.mrb[0].mxu0 %vm47_vm1, %v306_v3 }
  0xf0   :  { %v113_v7 = vpop.f32.mrb[0].mxu0 }
  0xf1   :  { %v120_v9 = vadd.f32 %v113_v7, %v52_v6  ;;  %v288_v10 = vpop.f32.mrb[1].mxu0 }
  0xf2   :  { %v116_v11 = vpop.f32.mrb[2].mxu0 }
  0xf3   :  { %122 = vst.msk [vmem:[#allocation2] sm:$0xff] %vm47_vm1, %v120_v9  ;;  %v121_v12 = vadd.f32 %v116_v11, %v53_v8  ;;  %v289_v13 = vpop.f32.mrb[3].mxu0 }
  0xf5   :  { %123 = vst.msk [vmem:[#allocation2 + $0x8] sm:$0xff] %vm47_vm1, %v121_v12 }
  0xfa   :  { %v127_v15 = vld [vmem:[#allocation2] sm:$0xff] }
  0xfb   :  { %v136_v16 = vadd.f32 %v271_v14, %v127_v15 }
  0xfc   :  { %v128_v17 = vld [vmem:[#allocation2 + $0x8] sm:$0xff] }
  0xfd   :  { %v140_v18 = vmul.f32 0.044715, %v136_v16  ;;  %v137_v19 = vadd.f32 %v271_v14, %v128_v17  ;;  %v138_v30 = vmul.f32 0.5, %v136_v16 }
  0xff   :  { %v142_v20 = vmul.f32 %v140_v18, %v136_v16  ;;  %v141_v21 = vmul.f32 0.044715, %v137_v19  ;;  %v139_v34 = vmul.f32 0.5, %v137_v19 }
 0x101   :  { %v144_v22 = vmul.f32 %v142_v20, %v136_v16  ;;  %v143_v23 = vmul.f32 %v141_v21, %v137_v19 }
 0x103   :  { %v146_v24 = vadd.f32 %v144_v22, %v136_v16  ;;  %v145_v25 = vmul.f32 %v143_v23, %v137_v19 }
 0x105   :  { %v148_v26 = vmul.f32 0.7978846, %v146_v24  ;;  %v147_v27 = vadd.f32 %v145_v25, %v137_v19 }
 0x107   :  { %309 = vtanh.f32 %v148_v26  ;;  %v149_v28 = vmul.f32 0.7978846, %v147_v27 }
 0x109   :  { %311 = vtanh.f32 %v149_v28 }
 0x111   :  { %v310_v29 = vpop.eup %309 }
 0x112   :  { %v152_v31 = vadd.f32 1.0, %v310_v29 }
 0x113   :  { %v312_v32 = vpop.eup %311 }
 0x114   :  { %v154_v33 = vmul.f32 %v152_v31, %v138_v30  ;;  %v153_v35 = vadd.f32 1.0, %v312_v32 }
 0x116   :  { %v157_v36 = vsel %vm47_vm1, %v154_v33, 0.0  ;;  %v155_v37 = vmul.f32 %v153_v35, %v139_v34 }
 0x117   :  { %v158_v38 = vrot.slane %v157_v36, 4 }
 0x118   :  { %v164_v39 = vsel %vm47_vm1, %v155_v37, 0.0 }
 0x119   :  { %v165_v40 = vrot.slane %v164_v39, 4  ;;  %v159_v41 = vadd.f32 %v158_v38, %v157_v36 }
 0x11b   :  { %v160_v42 = vrot.slane %v159_v41, 2  ;;  %v166_v43 = vadd.f32 %v165_v40, %v164_v39 }
 0x11d   :  { %v161_v44 = vadd.f32 %v160_v42, %v159_v41  ;;  %v167_v45 = vrot.slane %v166_v43, 2 }
 0x11f   :  { %v162_v46 = vrot.slane %v161_v44, 1  ;;  %v168_v47 = vadd.f32 %v167_v45, %v166_v43 }
 0x121   :  { %v169_v48 = vrot.slane %v168_v47, 1  ;;  %v163_v50 = vadd.f32 %v162_v46, %v161_v44 }
 0x123   :  { %v170_v51 = vadd.f32 %v169_v48, %v168_v47 }
 0x125   :  { %v174_v52 = vsel %vm173_vm3, %v170_v51, %v163_v50 }
 0x126   :  { %v176_v53 = vadd.f32 %v174_v52, %v156_v49 }
 0x128   :  { %178 = vst.msk [vmem:[#allocation3] sm:$0x3] %vm42_vm0, %v176_v53 }
 0x12f   :  { %v181_v54 = vld [vmem:[#allocation3] sm:$0x3] }
 0x130   :  { %v182_v55 = vmul.f32 0.125, %v181_v54 }
 0x132   :  { %v183_v56 = vpack.c.bf16 %v182_v55, %v182_v55 }
 0x134   :  { %295 = vmatmul.mubr.msk.bf16.vlgmr.msra.gmra.mrb[0].mxu1 %vm47_vm1, %v183_v56 }
 0x207   :  { %v244_v58 = vpop.f32.mrb[0].mxu1 }
 0x208   :  { %v245_v59 = vadd.f32 %v272_v57, %v244_v58  ;;  %v296_v60 = vpop.f32.mrb[1].mxu1 }
 0x209   :  { %v247_v61 = vpop.f32.mrb[2].mxu1 }
 0x20a   :  { %v297_v62 = vpop.f32.mrb[3].mxu1  ;;  %251 = vst.msk [vmem:[#allocation7] sm:$0x3] %vm250_vm4, %v245_v59 }
 0x20b   :  { %346 = shalt.err (!%p343_p12)
}
 0x20c   :  { %s347_s4 = scalar_lea.hbm %s454_s5, 32 }
 0x20d   :  { %p348_p13 = scmp.ne.s32.totalorder %s454_s5, %s347_s4  ;;  %p351_p0 = scmp.lt.u32.totalorder %s347_s4, %s454_s5 }
 0x20f   :  { %p353_p1 = pnand %p351_p0, %p348_p13 }
 0x211   :  { %356 = shalt.err (!%p353_p1)
}
 0x212   :  { %261 = dma.vmem_to_hbm [thread:$0]  %s259_s16, 32, %s454_s5, [#allocation6]  }
 0x213   :  { %359 = dma.done.wait [#allocation6], 32  }
 0x214   :  { %360 = vsyncadd [#allocation6], 4294967264 }
 0x215   :  { %265 = vsyncpa [#allocation5], 1 }
 0x216   :  { %266 = vsyncpa [#allocation6], 1 }

</bundles_post_ra>
